<compile_context>
chip_gen: v6e
topology: v6e:2x2x1
jax: 0.10.0
libtpu: 0.0.40
codegen_flags: <defaults>
</compile_context>

<pallas_src>
import jax
import jax.numpy as jnp
from jax.experimental import pallas as pl
from jax.experimental.pallas import tpu as pltpu


# ---------------------------------------------------------------------------
# Pallas kernel: one (tb, td) output tile, one module_size slice m per step.
# ---------------------------------------------------------------------------
def _n2cw_kernel(x_ref, w1_ref, b1_ref, wn_ref, r_ref, out_ref):
    m = pl.program_id(2)

    # Initialise the resident accumulator with the folded bias term
    #   r[b, d] = bound * (b1_norm[d, b] - b2_norm[d, b]).
    @pl.when(m == 0)
    def _init():
        out_ref[...] = r_ref[...]

    # z = x @ W1[:, :, m]   (tb, td), f32 accumulation on the MXU.
    z = jnp.dot(x_ref[...], w1_ref[...], preferred_element_type=jnp.float32)
    # Accumulate tanh(z + b1[m]) * (bound * Wn[:, m])  (broadcast over batch).
    out_ref[...] += jnp.tanh(z + b1_ref[...]) * wn_ref[...]


# ---------------------------------------------------------------------------
# Wrapper: parameter-only preprocessing (normalize_cw, packing) is plain-JAX;
# all data-dependent compute happens inside the Pallas kernel.
# ---------------------------------------------------------------------------
def n2cw_forward(x, weight1, bias1, weight2, bias2, bias2neg, bound, *,
                 block_b=None, block_d=None, param_dtype=jnp.float32):
    D, I, M = weight1.shape                     # (dim_out, dim_in, module_size)
    B = x.shape[0]
    xf = x.reshape(B, -1).astype(jnp.float32)   # x.view(x.size(0), -1)
    assert xf.shape[1] == I
    # The original torch broadcasting in normalize_cw / forward requires this.
    assert M == D and B == D, "torch N2CW broadcasting needs batch == dim_out == module_size"

    # Tile sizes: full dims at toy scale; choose tb mult-of-8, td mult-of-128
    # (lane-dense output blocks) at production scale.
    tb = B if block_b is None else block_b
    td = D if block_d is None else block_d
    assert B % tb == 0 and D % td == 0

    # ---- normalize_cw: mirrors torch broadcasting exactly (parameter-only) ----
    A = jnp.abs(weight2)                                            # (D, M, 1)
    sums = A.sum(axis=1) + jnp.abs(bias2) + jnp.abs(bias2neg)       # (D, D, 1)
    k = M + 2
    Wn = (1.0 / k + A) / (1.0 + sums)                               # (D, M, 1)
    b1n = (1.0 / k + jnp.abs(bias2)) / (1.0 + sums)                 # (D, D, 1)
    b2n = (1.0 / k + jnp.abs(bias2neg)) / (1.0 + sums)              # (D, D, 1)

    # ---- layout glue: pack m-major, fold `bound` into the weights ----
    w1_pack = jnp.transpose(weight1, (2, 1, 0)).astype(param_dtype)  # (M, I, D)
    b1_pack = bias1[:, 0, :].T[:, None, :].astype(jnp.float32)       # (M, 1, D)
    wn_pack = (bound * Wn[..., 0]).T[:, None, :].astype(jnp.float32) # (M, 1, D)
    r = (bound * (b1n[..., 0] - b2n[..., 0])).T.astype(jnp.float32)  # (B, D)
    xf = xf.astype(param_dtype)

    p_bytes = jnp.dtype(param_dtype).itemsize
    cost = pl.CostEstimate(
        flops=2 * B * I * D * M + 3 * B * D * M,
        transcendentals=B * D * M,
        bytes_accessed=(B * I * p_bytes + M * I * D * p_bytes
                        + 2 * M * D * 4 + 2 * B * D * 4),
    )

    # TODO(synk): add an inner K-split (dim_in tiling + f32 z-accumulator scratch)
    # for very large dim_in; not needed at these shapes.
    out = pl.pallas_call(
        _n2cw_kernel,
        out_shape=jax.ShapeDtypeStruct((B, D), jnp.float32),
        grid=(B // tb, D // td, M),
        in_specs=[
            pl.BlockSpec((tb, I), lambda b, d, m: (b, 0)),           # x        (B, I)
            pl.BlockSpec((None, I, td), lambda b, d, m: (m, 0, d)),  # w1_pack  (M, I, D)
            pl.BlockSpec((None, 1, td), lambda b, d, m: (m, 0, d)),  # b1_pack  (M, 1, D)
            pl.BlockSpec((None, 1, td), lambda b, d, m: (m, 0, d)),  # wn_pack  (M, 1, D)
            pl.BlockSpec((tb, td), lambda b, d, m: (b, d)),          # r        (B, D)
        ],
        out_specs=pl.BlockSpec((tb, td), lambda b, d, m: (b, d)),
        compiler_params=pltpu.CompilerParams(
            dimension_semantics=("parallel", "parallel", "arbitrary")),
        cost_estimate=cost,
    )(xf, w1_pack, b1_pack, wn_pack, r)
    return out


# ---------------------------------------------------------------------------
# Pure-JAX reference that literally mirrors the PyTorch forward (for checking)
# ---------------------------------------------------------------------------
def n2cw_reference(x, weight1, bias1, weight2, bias2, bias2neg, bound):
    B = x.shape[0]
    xf = x.reshape(B, -1)
    hidden = jnp.tanh(jnp.einsum('bi,dim->dbm', xf, weight1) + bias1)   # (D, B, M)
    A = jnp.abs(weight2)
    sums = A.sum(axis=1) + jnp.abs(bias2) + jnp.abs(bias2neg)           # (D, D, 1)
    k = A.shape[1] + 2
    W = (1.0 / k + A) / (1.0 + sums)
    b1n = (1.0 / k + jnp.abs(bias2)) / (1.0 + sums)
    b2n = (1.0 / k + jnp.abs(bias2neg)) / (1.0 + sums)
    o = bound * (jnp.einsum('dbm,dmo->dbo', hidden, W) + b1n - b2n)     # (D, B, 1)
    return jnp.transpose(o[..., 0], (1, 0))                             # (B, D)


if __name__ == "__main__":
    # Small shapes consistent with the module's broadcasting requirements:
    # shape_in=(4,4) -> dim_in=16, dim_out=module_size=batch=8, bound=2.0, afunc=tanh
    shape_in = (4, 4)
    dim_in = 4 * 4
    dim_out = 8
    module_size = 8
    batch = 8
    bound = 2.0

    key = jax.random.PRNGKey(0)
    k1, k2, kx = jax.random.split(key, 3)

    std = 1.0 / dim_in ** 0.5
    weight1 = jax.random.uniform(k1, (dim_out, dim_in, module_size), jnp.float32, -std, std)
    bias1 = jax.random.uniform(k2, (dim_out, 1, module_size), jnp.float32, -std, std)
    weight2 = jnp.full((dim_out, module_size, 1), 0.05, jnp.float32)
    bias2 = jnp.full((dim_out, 1, 1), 0.05, jnp.float32)
    bias2neg = jnp.full((dim_out, 1, 1), 0.05, jnp.float32)

    x = jax.random.normal(kx, (batch,) + shape_in, jnp.float32)

    ref = n2cw_reference(x, weight1, bias1, weight2, bias2, bias2neg, bound)

    # f32 path: strict check against the PyTorch-mirroring reference.
    out = n2cw_forward(x, weight1, bias1, weight2, bias2, bias2neg, bound)
    out = jax.block_until_ready(out)
    assert out.shape == (batch, dim_out), out.shape
    assert bool(jnp.allclose(out, ref, rtol=1e-5, atol=1e-5)), "f32 mismatch vs reference"

    # bf16 weight/activation streaming path (halved HBM traffic, f32 MXU accumulation).
    out_bf16 = n2cw_forward(x, weight1, bias1, weight2, bias2, bias2neg, bound,
                            param_dtype=jnp.bfloat16)
    out_bf16 = jax.block_until_ready(out_bf16)
    assert bool(jnp.allclose(out_bf16, ref, rtol=1e-1, atol=1e-1)), "bf16 mismatch vs reference"

    print("KERNEL_OK")
</pallas_src>

<mosaic_0001>
module attributes {stable_mosaic.version = 11 : i64} {
  func.func @_n2cw_kernel(%arg0: i32, %arg1: i32, %arg2: i32, %arg3: memref<8x16xf32, #tpu.memory_space<vmem>>, %arg4: memref<1x16x8xf32, #tpu.memory_space<vmem>>, %arg5: memref<1x1x8xf32, #tpu.memory_space<vmem>>, %arg6: memref<1x1x8xf32, #tpu.memory_space<vmem>>, %arg7: memref<8x8xf32, #tpu.memory_space<vmem>>, %arg8: memref<8x8xf32, #tpu.memory_space<vmem>>) attributes {dimension_semantics = [#tpu.dimension_semantics<parallel>, #tpu.dimension_semantics<parallel>, #tpu.dimension_semantics<arbitrary>], iteration_bounds = array<i64: 1, 1, 8>, scalar_prefetch = 0 : i64, scratch_operands = 0 : i64, tpu.core_type = #tpu.core_type<tc>, window_params = [{transform_indices = @transform_0, window_bounds = array<i64: 8, 16>}, {transform_indices = @transform_1, window_bounds = array<i64: 1, 16, 8>}, {transform_indices = @transform_2, window_bounds = array<i64: 1, 1, 8>}, {transform_indices = @transform_3, window_bounds = array<i64: 1, 1, 8>}, {transform_indices = @transform_4, window_bounds = array<i64: 8, 8>}, {transform_indices = @transform_5, window_bounds = array<i64: 8, 8>}]} {
    %c0_i32 = arith.constant 0 : i32
    %0 = arith.cmpi eq, %arg2, %c0_i32 : i32
    %1 = arith.extui %0 : i1 to i32
    %c0_i32_0 = arith.constant 0 : i32
    %2 = arith.cmpi ne, %1, %c0_i32_0 : i32
    scf.if %2 {
      %c0_15 = arith.constant 0 : index
      %c0_16 = arith.constant 0 : index
      %19 = vector.load %arg7[%c0_15, %c0_16] : memref<8x8xf32, #tpu.memory_space<vmem>>, vector<8x8xf32>
      %c0_17 = arith.constant 0 : index
      %c0_18 = arith.constant 0 : index
      %20 = vector.load %arg8[%c0_17, %c0_18] : memref<8x8xf32, #tpu.memory_space<vmem>>, vector<8x8xf32>
      tpu.vector_store %arg8[%c0_17, %c0_18], %19 {strides = array<i32>} : memref<8x8xf32, #tpu.memory_space<vmem>>, vector<8x8xf32>,
    } else {
    }
    %c0 = arith.constant 0 : index
    %c0_1 = arith.constant 0 : index
    %3 = vector.load %arg3[%c0, %c0_1] : memref<8x16xf32, #tpu.memory_space<vmem>>, vector<8x16xf32>
    %c0_2 = arith.constant 0 : index
    %c0_3 = arith.constant 0 : index
    %c0_4 = arith.constant 0 : index
    %4 = vector.load %arg4[%c0_2, %c0_3, %c0_4] : memref<1x16x8xf32, #tpu.memory_space<vmem>>, vector<1x16x8xf32>
    %5 = vector.shape_cast %4 : vector<1x16x8xf32> to vector<16x8xf32>
    %cst = arith.constant dense<0.000000e+00> : vector<8x8xf32>
    %6 = tpu.matmul %3, %5, %cst {dimension_numbers = #tpu.dot_dimension_numbers<[1], [0], [0], [1], [0, 0, 1, 1], [], []>} : vector<8x16xf32>, vector<16x8xf32>, vector<8x8xf32> -> vector<8x8xf32>
    %c0_5 = arith.constant 0 : index
    %c0_6 = arith.constant 0 : index
    %7 = vector.load %arg8[%c0_5, %c0_6] : memref<8x8xf32, #tpu.memory_space<vmem>>, vector<8x8xf32>
    %c0_7 = arith.constant 0 : index
    %c0_8 = arith.constant 0 : index
    %c0_9 = arith.constant 0 : index
    %8 = vector.load %arg5[%c0_7, %c0_8, %c0_9] : memref<1x1x8xf32, #tpu.memory_space<vmem>>, vector<1x1x8xf32>
    %9 = vector.shape_cast %8 : vector<1x1x8xf32> to vector<1x8xf32>
    %10 = vector.broadcast %9 : vector<1x8xf32> to vector<8x8xf32>
    %11 = arith.addf %6, %10 : vector<8x8xf32>
    %12 = math.tanh %11 : vector<8x8xf32>
    %c0_10 = arith.constant 0 : index
    %c0_11 = arith.constant 0 : index
    %c0_12 = arith.constant 0 : index
    %13 = vector.load %arg6[%c0_10, %c0_11, %c0_12] : memref<1x1x8xf32, #tpu.memory_space<vmem>>, vector<1x1x8xf32>
    %14 = vector.shape_cast %13 : vector<1x1x8xf32> to vector<1x8xf32>
    %15 = vector.broadcast %14 : vector<1x8xf32> to vector<8x8xf32>
    %16 = arith.mulf %12, %15 : vector<8x8xf32>
    %17 = arith.addf %7, %16 : vector<8x8xf32>
    %c0_13 = arith.constant 0 : index
    %c0_14 = arith.constant 0 : index
    %18 = vector.load %arg8[%c0_13, %c0_14] : memref<8x8xf32, #tpu.memory_space<vmem>>, vector<8x8xf32>
    tpu.vector_store %arg8[%c0_13, %c0_14], %17 {strides = array<i32>} : memref<8x8xf32, #tpu.memory_space<vmem>>, vector<8x8xf32>,
    return
  }
  func.func @transform_0(%arg0: i32, %arg1: i32, %arg2: i32) -> (i32, i32) {
    %c0_i32 = arith.constant 0 : i32
    %c0_i32_0 = arith.constant 0 : i32
    return %arg0, %c0_i32 : i32, i32
  }
  func.func @transform_1(%arg0: i32, %arg1: i32, %arg2: i32) -> (i32, i32, i32) {
    %c0_i32 = arith.constant 0 : i32
    %c0_i32_0 = arith.constant 0 : i32
    return %arg2, %c0_i32, %arg1 : i32, i32, i32
  }
  func.func @transform_2(%arg0: i32, %arg1: i32, %arg2: i32) -> (i32, i32, i32) {
    %c0_i32 = arith.constant 0 : i32
    %c0_i32_0 = arith.constant 0 : i32
    return %arg2, %c0_i32, %arg1 : i32, i32, i32
  }
  func.func @transform_3(%arg0: i32, %arg1: i32, %arg2: i32) -> (i32, i32, i32) {
    %c0_i32 = arith.constant 0 : i32
    %c0_i32_0 = arith.constant 0 : i32
    return %arg2, %c0_i32, %arg1 : i32, i32, i32
  }
  func.func @transform_4(%arg0: i32, %arg1: i32, %arg2: i32) -> (i32, i32) {
    %c0_i32 = arith.constant 0 : i32
    return %arg0, %arg1 : i32, i32
  }
  func.func @transform_5(%arg0: i32, %arg1: i32, %arg2: i32) -> (i32, i32) {
    %c0_i32 = arith.constant 0 : i32
    return %arg0, %arg1 : i32, i32
  }
}

</mosaic_0001>

<bundles_post_ra>
// kernel: tpu_custom_call.1
= control target key start
LH: loop header
LB: loop body
LE: loop exit
PB: predicated region body
PF: predicated region fallthrough
CT: control target
= control target key end

     0   :  { %10 = vsyncpa [#allocation3], 0  ;;  %s721_s18 = smov 0   ;;  %s723_s19 = smov 0   ;;  %s781_s0 = inlined_call_operand.vmem [shape: f32[8,16], index: 0, kind: input, shape index: {}]   ;;  %s782_s1 = inlined_call_operand.vmem [shape: f32[8,16,8], index: 1, kind: input, shape index: {}]   ;;  %s783_s2 = inlined_call_operand.vmem [shape: f32[8,1,8], index: 2, kind: input, shape index: {}]   ;;  %s784_s3 = inlined_call_operand.vmem [shape: f32[8,1,8], index: 3, kind: input, shape index: {}]   ;;  %s785_s4 = inlined_call_operand.vmem [shape: f32[8,8], index: 4, kind: input, shape index: {}]   ;;  %s786_s5 = inlined_call_operand.hbm [shape: f32[8,8], index: 5, kind: output, shape index: {}]  }
   0x1   :  { %s725_s20 = smov 0  }
   0x2 LB: > { %s574_s21 = sadd.s32 4294967295, %s686_s20   ;;  %s28_s22 = sadd.s32 1, %s682_s19  ;;  %s686_s20 = sphi %s725_s20, %s16_s20   ;;  %s682_s19 = sphi %s723_s19, %s789_s19   ;;  %s678_s18 = sphi %s721_s18, %s788_s18  }
   0x3   : > { %p29_p0 = scmp.ge.s32.totalorder %s28_s22, 8  ;;  %p579_p1 = scmp.ge.s32.totalorder %s686_s20, 1 }
   0x4   : > { %p263_p2 = scmp.lt.s32.totalorder %s686_s20, 9 }
   0x5   : > { %s791_s22 = smov (%p29_p0, %s28_s22), 0 }
   0x6   : > { %p264_p3 = pnand %p579_p1, %p263_p2 }
   0x7   : > { %p316_p4 = scmp.lt.s32.totalorder (!%p264_p3), %s678_s18, 7  ;;  %p582_p5 = scmp.ne.s32.totalorder (!%p264_p3), %s678_s18, 0 }
   0x8   : > { %267 = sbr.rel (%p264_p3) target bundleno = 244 (0xf4), region = 40 }
   0xd   : > { %s317_s23 = scalar_select %p316_p4, %s678_s18, 7 }
   0xe   : > { %346 = sbr.rel (%p582_p5) target bundleno = 21 (0x15), region = 44 }
   0xf   : > { %s590_s24 = sshll.u32 %s317_s23, 4  ;;  %s329_s27 = scalar_lea.vmem %s783_s2, %s317_s23 }
  0x10   : > { %s323_s30 = scalar_lea.vmem %s782_s1, %s590_s24  ;;  %s335_s8 = scalar_lea.vmem %s784_s3, %s317_s23 }
  0x13   : > { %v347_v0 = vld [vmem:[%s785_s4] sm:$0xff]  ;;  %vm348_vm0 = vcmask 64512  }
  0x14   : > { %349 = vst.msk [vmem:[#allocation2] sm:$0xff] %vm348_vm0, %v347_v0 }
  0x15 PF: > { %v352_v1 = vld [vmem:[%s323_s30 + $0x8] sm:$0xff]  ;;  %v688_v2 = vmov 0.0   ;;  %v351_v3 = vld [vmem:[%s323_s30] sm:$0xff]  ;;  %vm689_vm1 = vmmov 0   ;;  %vm361_vm2 = vcmask 130048   ;;  %s690_s13 = smov [#allocation2]  }
  0x16   : > { %594 = vmatprep.subr.mxu0 %v688_v2  ;;  %598 = vmatprep.mubr.msk.f32.mxu0 %vm689_vm1, %v688_v2  ;;  %v350_v4 = vld [vmem:[%s781_s0] sm:$0xff]  ;;  %s457_s14 = sshll.u32 %s690_s13, 4  ;;  %vm445_vm3 = vcmask 64512   ;;  %p757_p6 = scmp.eq.s32.totalorder %s574_s21, 7  ;;  %s458_s14 = int_to_ptr.vmem [resolvable:$true] %s457_s14 }
  0x17   : > { %595 = vmatpush3.msra.mxu0 %v352_v1  ;;  %v583_v5 = vld [vmem:[%s329_s27] ss:$0 sm:$0xff]  ;;  %s636_s16 = scalar_lea.vmem %s458_s14, 128  ;;  %p643_p10 = scmp.lt.s32.totalorder %s458_s14, %s458_s14 }
  0x18   : > { %596 = vmatprep.subr.mxu0 %v688_v2  ;;  %v585_v9 = vld [vmem:[%s335_s8] ss:$0 sm:$0xff]  ;;  %p637_p7 = scmp.ne.s32.totalorder %s458_s14, %s636_s16  ;;  %p644_p11 = scmp.lt.s32.totalorder %s636_s16, %s636_s16 }
  0x19   : > { %597 = vmatpush3.msra.mxu0 %v351_v3 }
  0x1a   : > { %599 = vmatmul.mubr.msk.f32.vlgmr.msra.gmra.mxu0 %vm361_vm2, %v350_v4  ;;  %p638_p8 = pnand %p637_p7, %p757_p6  ;;  %p645_p12 = por %p644_p11, %p643_p10 }
  0x1b   : > { %v353_v11 = vld [vmem:[#allocation2] sm:$0xff] }
  0x1c   : > { %p639_p9 = pneg %p638_p8 }
  0x1e   : > { %p646_p13 = pnand %p645_p12, %p639_p9 }
  0xda   : > { %v431_v6 = vpop.f32.mrf.mxu0 }
  0xdb   : > { %v432_v7 = vadd.f32 %v583_v5, %v431_v6 }
  0xdc   : > { %v600_v8 = vpop.f32.mrf.mxu0 }
  0xdd   : > { %634 = vtanh.f32 %v432_v7 }
  0xea   : > { %v635_v10 = vpop.eup %634 }
  0xeb   : > { %v443_v12 = vmul.f32 %v635_v10, %v585_v9 }
  0xed   : > { %v444_v13 = vadd.f32 %v443_v12, %v353_v11 }
  0xef   : > { %446 = vst.msk [vmem:[#allocation2] sm:$0xff] %vm445_vm3, %v444_v13 }
  0xf0   : > { %649 = shalt.err (!%p646_p13)
}
  0xf1   : > { %602 = dma.vmem_to_hbm [thread:$0]  (%p757_p6), %s458_s14, 128, %s786_s5, [#allocation3]  }
  0xf2   : > { %673 = dma.done.wait (%p757_p6), [#allocation3], 128  }
  0xf3   : > { %675 = vsyncadd (%p757_p6), [#allocation3], 4294967168 }
  0xf4 PF: > { %s16_s20 = sadd.s32 1, %s686_s20   ;;  %s788_s18 = smov %s682_s19 }
  0xf5   : > { %p13_p0 = scmp.ge.s32.totalorder %s16_s20, 10   ;;  %s789_s19 = smov %s791_s22 }
  0xf7   :  { %15 = sbr.rel (!%p13_p0) target bundleno = 2 (0x2), region = 84 }
  0xfc   :  { %470 = vsyncpa [#allocation3], 1 }
  0xfd   :  { %472 = vsyncpa [#allocation3 + $0x1], 1 }

</bundles_post_ra>
